<compile_context>
chip_gen: v7x
topology: tpu7x:2x2x1
jax: 0.10.0
libtpu: 0.0.40
codegen_flags: <defaults>
</compile_context>

<pallas_src>
import functools
import math

import jax
import jax.numpy as jnp
from jax.experimental import pallas as pl
from jax.experimental.pallas import tpu as pltpu


def _round_up(x, m):
    return ((x + m - 1) // m) * m


# ---------------------------------------------------------------------------
# Pallas kernel 1: fused duration / range projections (LinearNorm(dim, 1, bias=False))
# Single no-grid invocation, whole arrays resident in VMEM, lane-dense (B, N) outputs.
# ---------------------------------------------------------------------------
def _proj_kernel(dur_h_ref, rng_h_ref, w_dur_ref, w_rng_ref, dur_ref, rng_ref):
    # dur_h_ref: (B, N, Dd), w_dur_ref: (1, 1, Dd).  Projection to a single output
    # channel == broadcast-mul + lane reduce; outputs are (B, N) with N on lanes.
    dproj = jnp.sum(dur_h_ref[...] * w_dur_ref[...], axis=-1)          # (B, N)
    rproj = jnp.sum(rng_h_ref[...] * w_rng_ref[...], axis=-1)          # (B, N)
    dur_ref[...] = dproj.astype(dur_ref.dtype)
    # numerically stable softplus(x) = max(x, 0) + log1p(exp(-|x|))
    rng_ref[...] = (jnp.maximum(rproj, 0.0)
                    + jnp.log1p(jnp.exp(-jnp.abs(rproj)))).astype(rng_ref.dtype)


def _projections(duration_h, range_h, w_duration, w_range):
    b, n, dd = duration_h.shape
    dr = range_h.shape[-1]
    dur, rng = pl.pallas_call(
        _proj_kernel,
        out_shape=(jax.ShapeDtypeStruct((b, n), jnp.float32),
                   jax.ShapeDtypeStruct((b, n), jnp.float32)),
    )(duration_h, range_h,
      w_duration.reshape(1, 1, dd), w_range.reshape(1, 1, dr))
    return dur, rng


# ---------------------------------------------------------------------------
# Pallas kernel 2: fused Gaussian upsampling + in-kernel positional embedding
# ---------------------------------------------------------------------------
def _gauss_pe_kernel(h_ref, c_ref, ssq_ref, bias_ref, pe_ref, u_ref, w_ref, *,
                     t_tile, d_model, use_bf16_mxu):
    # Frame-row index for this tile (column vector, broadcast against lane vectors).
    t0 = (pl.program_id(1) * t_tile).astype(jnp.float32)
    row = (jax.lax.broadcasted_iota(jnp.int32, (t_tile, 1), 0)
           .astype(jnp.float32) + t0)                     # 0-based frame index (t_tile, 1)

    c = c_ref[0]                                          # (1, N) centers: cumsum(d) - d/2
    ssq = ssq_ref[0]                                      # (1, N) std_dev**2 (hoisted square)
    bias = bias_ref[0]                                    # (1, N) 0.0 valid / -inf padded

    # power = |t - c|^2 / -1 * std^2  (verbatim from the torch module; t is 1-based),
    # length mask folded in as an additive -inf bias (replaces the per-tile where).
    power = -jnp.square((row + 1.0) - c) * ssq + bias     # (t_tile, N)
    m = jnp.max(power, axis=-1, keepdims=True)
    p = jnp.exp(power - m)
    denom = jnp.sum(p, axis=-1, keepdims=True)
    # EUP approximate reciprocal + one Newton step (full f32 accuracy, no VPU divide).
    r = pl.reciprocal(denom, approx=True)
    r = r * (2.0 - denom * r)
    w = p * r                                             # softmax over phonemes

    h = h_ref[0]                                          # (N, D) resident per batch index
    if use_bf16_mxu:
        # bf16-native MXU path (v5e/v6e win); f32 accumulate. Off by default to
        # preserve the autocast(enabled=False) f32 contract.
        u = jnp.dot(w.astype(jnp.bfloat16), h.astype(jnp.bfloat16),
                    preferred_element_type=jnp.float32)   # (t_tile, D)
    else:
        u = jnp.dot(w, h, preferred_element_type=jnp.float32)

    # Positional embedding computed in-kernel: angle = pos * divisor, sin on even
    # lanes / cos on odd lanes (EUP slot; no HBM PE stream, no re-streaming per batch).
    div = pe_ref[0:1, :]                                  # (1, pe_dim) frequency divisor
    even = pe_ref[1:2, :]                                 # (1, pe_dim) 1.0 where even index
    angle = row * div                                     # 0-based positions, (t_tile, pe_dim)
    pe = jnp.where(even > 0.5, jnp.sin(angle), jnp.cos(angle))

    # Direct slice stores (no concatenate temp, no extra VMEM copy).
    u_ref[0, :, :d_model] = u.astype(u_ref.dtype)
    u_ref[0, :, d_model:] = pe.astype(u_ref.dtype)
    w_ref[0] = w.astype(w_ref.dtype)


def _gaussian_upsampling_with_pe(h, center, std_dev, valid, max_T, *,
                                 pe_dim, timestep_denominator, t_tile=None,
                                 use_bf16_mxu=False):
    b, n, d_model = h.shape

    # Frame-tile size: big tiles pipeline well; per-step VMEM footprint stays a few
    # MiB at realistic sizes.  v7x knob: raise to 1024-2048 and/or add
    # pipeline_mode=pl.Buffered(3) on the out_specs (64 MiB VMEM is ~20x headroom).
    if t_tile is None:
        t_tile = 512
    if t_tile >= max_T:
        t_tile = max_T                     # single full-extent block (always layout-legal)
    else:
        t_tile = _round_up(t_tile, 8)      # keep sublane (8) alignment for the block
        t_tile = min(t_tile, max_T)
    num_t = pl.cdiv(max_T, t_tile)         # ragged last block handled by Pallas: no pad,
                                            # no post-kernel slice of the outputs.

    # Tiny (2, pe_dim) table: row 0 = frequency divisor, row 1 = even-index indicator.
    col = jnp.arange(pe_dim, dtype=jnp.int32)
    i_even = ((col // 2) * 2).astype(jnp.float32)
    divisor = jnp.exp(i_even * (-math.log(timestep_denominator) / pe_dim))
    even = (col % 2 == 0).astype(jnp.float32)
    pe_params = jnp.stack([divisor, even], axis=0).astype(jnp.float32)   # (2, pe_dim)

    c3 = center.reshape(b, 1, n).astype(jnp.float32)
    ssq3 = jnp.square(std_dev).reshape(b, 1, n).astype(jnp.float32)      # hoisted square
    bias3 = jnp.where(valid, 0.0, -jnp.inf).reshape(b, 1, n).astype(jnp.float32)

    kernel = functools.partial(_gauss_pe_kernel, t_tile=t_tile, d_model=d_model,
                               use_bf16_mxu=use_bf16_mxu)
    u_cat, w = pl.pallas_call(
        kernel,
        out_shape=(jax.ShapeDtypeStruct((b, max_T, d_model + pe_dim), jnp.float32),
                   jax.ShapeDtypeStruct((b, max_T, n), jnp.float32)),
        grid=(b, num_t),
        in_specs=[
            pl.BlockSpec((1, n, d_model), lambda bi, ti: (bi, 0, 0)),  # H resident per batch
            pl.BlockSpec((1, 1, n), lambda bi, ti: (bi, 0, 0)),        # centers
            pl.BlockSpec((1, 1, n), lambda bi, ti: (bi, 0, 0)),        # std_dev**2
            pl.BlockSpec((1, 1, n), lambda bi, ti: (bi, 0, 0)),        # -inf length-mask bias
            pl.BlockSpec((2, pe_dim), lambda bi, ti: (0, 0)),          # PE divisor/parity table
        ],
        out_specs=(
            pl.BlockSpec((1, t_tile, d_model + pe_dim), lambda bi, ti: (bi, ti, 0)),
            pl.BlockSpec((1, t_tile, n), lambda bi, ti: (bi, ti, 0)),
        ),
        compiler_params=pltpu.CompilerParams(
            dimension_semantics=("parallel", "parallel"),
        ),
    )(h, c3, ssq3, bias3, pe_params)
    return u_cat, w


# ---------------------------------------------------------------------------
# Bidirectional 2-layer LSTM with packed-sequence semantics (plain JAX, lax.scan)
# ---------------------------------------------------------------------------
def _lstm_cell(x_t, h, c, w_ih, w_hh, b_ih, b_hh):
    gates = x_t @ w_ih.T + b_ih + h @ w_hh.T + b_hh
    i, f, g, o = jnp.split(gates, 4, axis=-1)            # PyTorch gate order: i, f, g, o
    c_new = jax.nn.sigmoid(f) * c + jax.nn.sigmoid(i) * jnp.tanh(g)
    h_new = jax.nn.sigmoid(o) * jnp.tanh(c_new)
    return h_new, c_new


def _lstm_direction(x, lengths, weights, reverse):
    w_ih, w_hh, b_ih, b_hh = weights
    b, n, _ = x.shape
    hidden = w_hh.shape[1]
    xt = jnp.transpose(x, (1, 0, 2))                      # time-major (N, B, F)
    ts = jnp.arange(n)
    if reverse:
        xt = xt[::-1]
        ts = ts[::-1]

    def step(carry, inp):
        h, c = carry
        x_t, t = inp
        h_new, c_new = _lstm_cell(x_t, h, c, w_ih, w_hh, b_ih, b_hh)
        is_valid = (t < lengths).astype(x.dtype)[:, None]  # (B, 1)
        # packed-sequence semantics: state only advances inside each sequence,
        # outputs at padded steps are zero (pad_packed_sequence zero-fills).
        h = is_valid * h_new + (1.0 - is_valid) * h
        c = is_valid * c_new + (1.0 - is_valid) * c
        return (h, c), is_valid * h_new

    init = (jnp.zeros((b, hidden), x.dtype), jnp.zeros((b, hidden), x.dtype))
    _, outs = jax.lax.scan(step, init, (xt, ts))
    outs = jnp.transpose(outs, (1, 0, 2))                 # (B, N, H)
    if reverse:
        outs = outs[:, ::-1, :]
    return outs


def _bilstm(x, lengths, layer_params):
    out = x
    for layer in layer_params:
        fwd = _lstm_direction(out, lengths, layer["fwd"], reverse=False)
        bwd = _lstm_direction(out, lengths, layer["bwd"], reverse=True)
        out = jnp.concatenate([fwd, bwd], axis=-1)
    return out


# ---------------------------------------------------------------------------
# Duration.forward
# ---------------------------------------------------------------------------
def duration_forward(h, d_sec, max_T, input_lengths,
                     duration_lstm_params, range_lstm_params,
                     w_duration, w_range, *,
                     frame_size, positional_embedding_dim, timestep_denominator,
                     t_tile=None, use_bf16_mxu=False):
    h = h.astype(jnp.float32)
    b, n, d_model = h.shape
    valid = jnp.arange(n)[None, :] < input_lengths[:, None]            # mask = ~valid

    d = jnp.round(d_sec * frame_size).astype(jnp.int32)                # frames per phoneme
    c = jnp.cumsum(d, axis=-1)
    range_in = jnp.concatenate([h, d[..., None].astype(jnp.float32)], axis=-1)

    duration_h = _bilstm(h, input_lengths, duration_lstm_params)       # (B, N, duration_rnn_dim)
    range_h = _bilstm(range_in, input_lengths, range_lstm_params)      # (B, N, range_rnn_dim)

    # Fused Pallas projections: pred_duration = duration_h @ W_d^T,
    #                           range_output  = softplus(range_h @ W_r^T)
    pred_duration, range_output = _projections(duration_h, range_h, w_duration, w_range)

    center = c.astype(jnp.float32) - d.astype(jnp.float32) / 2.0
    U, weights = _gaussian_upsampling_with_pe(
        h, center, range_output, valid, max_T,
        pe_dim=positional_embedding_dim,
        timestep_denominator=timestep_denominator,
        t_tile=t_tile, use_bf16_mxu=use_bf16_mxu)
    return U, pred_duration, weights


# ---------------------------------------------------------------------------
# Deterministic parameter construction
# ---------------------------------------------------------------------------
def _make_bilstm_params(key, input_dim, hidden, num_layers):
    params = []
    in_dim = input_dim
    bound = 1.0 / math.sqrt(hidden)
    for _ in range(num_layers):
        layer = {}
        for direction in ("fwd", "bwd"):
            key, k1, k2, k3, k4 = jax.random.split(key, 5)
            layer[direction] = (
                jax.random.uniform(k1, (4 * hidden, in_dim), jnp.float32, -bound, bound),
                jax.random.uniform(k2, (4 * hidden, hidden), jnp.float32, -bound, bound),
                jax.random.uniform(k3, (4 * hidden,), jnp.float32, -bound, bound),
                jax.random.uniform(k4, (4 * hidden,), jnp.float32, -bound, bound),
            )
        params.append(layer)
        in_dim = 2 * hidden
    return params


def _xavier_row(key, in_dim):
    limit = math.sqrt(6.0 / (in_dim + 1))
    return jax.random.uniform(key, (1, in_dim), jnp.float32, -limit, limit)


if __name__ == "__main__":
    key = jax.random.PRNGKey(0)
    # Small shapes consistent with the module.
    B, N = 2, 8                          # batch, phoneme steps
    encoder_output_dim = 32
    positional_embedding_dim = 32
    duration_rnn_dim = 32
    range_rnn_dim = 32
    timestep_denominator = 10000.0
    sampling_rate, hop_length = 22050, 256
    frame_size = sampling_rate / hop_length

    k_h, k_d, k_dl, k_rl, k_wd, k_wr = jax.random.split(key, 6)
    input_lengths = jnp.array([N, N - 2], dtype=jnp.int32)   # sorted desc (packed sequences)
    valid = jnp.arange(N)[None, :] < input_lengths[:, None]
    h = jax.random.normal(k_h, (B, N, encoder_output_dim), jnp.float32)
    d_sec = jax.random.uniform(k_d, (B, N), jnp.float32, 0.02, 0.06) * valid

    dur_lstm_params = _make_bilstm_params(k_dl, encoder_output_dim, duration_rnn_dim // 2, 2)
    rng_lstm_params = _make_bilstm_params(k_rl, encoder_output_dim + 1, range_rnn_dim // 2, 2)
    w_duration = _xavier_row(k_wd, duration_rnn_dim)   # LinearNorm(dim, 1, bias=False) weight
    w_range = _xavier_row(k_wr, range_rnn_dim)

    # max_T is an input of forward(); derive it from rounded durations (like inference()).
    d_frames = jnp.round(d_sec * frame_size).astype(jnp.int32)
    max_T = int(jnp.max(jnp.cumsum(d_frames, axis=-1)))

    U, pred_duration, weights = duration_forward(
        h, d_sec, max_T, input_lengths,
        dur_lstm_params, rng_lstm_params, w_duration, w_range,
        frame_size=frame_size,
        positional_embedding_dim=positional_embedding_dim,
        timestep_denominator=timestep_denominator)
    U, pred_duration, weights = jax.block_until_ready((U, pred_duration, weights))

    # --- sanity checks against the module's semantics ---
    assert U.shape == (B, max_T, encoder_output_dim + positional_embedding_dim), U.shape
    assert pred_duration.shape == (B, N), pred_duration.shape
    assert weights.shape == (B, max_T, N), weights.shape
    assert bool(jnp.all(jnp.isfinite(U))) and bool(jnp.all(jnp.isfinite(weights)))
    # softmax rows sum to 1
    assert bool(jnp.allclose(weights.sum(-1), 1.0, atol=1e-3))
    # padded phonemes of the shorter sequence get ~zero attention weight
    assert float(jnp.max(jnp.abs(weights[1, :, int(input_lengths[1]):]))) < 1e-6
    # padded phonemes produce zero duration prediction (pad_packed zero-fill)
    assert float(jnp.max(jnp.abs(pred_duration[1, int(input_lengths[1]):]))) < 1e-6
    # positional-embedding half of U matches the closed form
    pos = jnp.arange(max_T, dtype=jnp.float32)[:, None]
    i = jnp.arange(0, positional_embedding_dim, 2, dtype=jnp.float32)
    div = jnp.exp(i * (-math.log(timestep_denominator) / positional_embedding_dim))
    pe_ref = jnp.zeros((max_T, positional_embedding_dim), jnp.float32)
    pe_ref = pe_ref.at[:, 0::2].set(jnp.sin(pos * div))
    pe_ref = pe_ref.at[:, 1::2].set(jnp.cos(pos * div))
    assert bool(jnp.allclose(
        U[:, :, encoder_output_dim:],
        jnp.broadcast_to(pe_ref, (B, max_T, positional_embedding_dim)),
        atol=1e-4))
    # gaussian half of U is a convex combination of H rows (weights sum to 1)
    assert bool(jnp.all(jnp.abs(U[:, :, :encoder_output_dim])
                        <= jnp.max(jnp.abs(h)) + 1e-3))

    print("KERNEL_OK")
</pallas_src>

<mosaic_0001>
module attributes {stable_mosaic.version = 11 : i64} {
  func.func @_proj_kernel(%arg0: memref<2x8x32xf32, #tpu.memory_space<vmem>>, %arg1: memref<2x8x32xf32, #tpu.memory_space<vmem>>, %arg2: memref<1x1x32xf32, #tpu.memory_space<vmem>>, %arg3: memref<1x1x32xf32, #tpu.memory_space<vmem>>, %arg4: memref<2x8xf32, #tpu.memory_space<vmem>>, %arg5: memref<2x8xf32, #tpu.memory_space<vmem>>) attributes {dimension_semantics = [], scalar_prefetch = 0 : i64, scratch_operands = 0 : i64, tpu.core_type = #tpu.core_type<tc>} {
    %c0 = arith.constant 0 : index
    %c0_0 = arith.constant 0 : index
    %c0_1 = arith.constant 0 : index
    %0 = vector.load %arg0[%c0, %c0_0, %c0_1] : memref<2x8x32xf32, #tpu.memory_space<vmem>>, vector<2x8x32xf32>
    %c0_2 = arith.constant 0 : index
    %c0_3 = arith.constant 0 : index
    %c0_4 = arith.constant 0 : index
    %1 = vector.load %arg2[%c0_2, %c0_3, %c0_4] : memref<1x1x32xf32, #tpu.memory_space<vmem>>, vector<1x1x32xf32>
    %2 = vector.broadcast %1 : vector<1x1x32xf32> to vector<2x8x32xf32>
    %3 = arith.mulf %0, %2 : vector<2x8x32xf32>
    %cst = arith.constant dense<0.000000e+00> : vector<2x8xf32>
    %4 = vector.multi_reduction <add>, %3, %cst [2] : vector<2x8x32xf32> to vector<2x8xf32>
    %c0_5 = arith.constant 0 : index
    %c0_6 = arith.constant 0 : index
    %c0_7 = arith.constant 0 : index
    %5 = vector.load %arg1[%c0_5, %c0_6, %c0_7] : memref<2x8x32xf32, #tpu.memory_space<vmem>>, vector<2x8x32xf32>
    %c0_8 = arith.constant 0 : index
    %c0_9 = arith.constant 0 : index
    %c0_10 = arith.constant 0 : index
    %6 = vector.load %arg3[%c0_8, %c0_9, %c0_10] : memref<1x1x32xf32, #tpu.memory_space<vmem>>, vector<1x1x32xf32>
    %7 = vector.broadcast %6 : vector<1x1x32xf32> to vector<2x8x32xf32>
    %8 = arith.mulf %5, %7 : vector<2x8x32xf32>
    %cst_11 = arith.constant dense<0.000000e+00> : vector<2x8xf32>
    %9 = vector.multi_reduction <add>, %8, %cst_11 [2] : vector<2x8x32xf32> to vector<2x8xf32>
    %c0_12 = arith.constant 0 : index
    %c0_13 = arith.constant 0 : index
    %10 = vector.load %arg4[%c0_12, %c0_13] : memref<2x8xf32, #tpu.memory_space<vmem>>, vector<2x8xf32>
    tpu.vector_store %arg4[%c0_12, %c0_13], %4 {strides = array<i32>} : memref<2x8xf32, #tpu.memory_space<vmem>>, vector<2x8xf32>,
    %cst_14 = arith.constant 0.000000e+00 : f32
    %11 = vector.broadcast %cst_14 : f32 to vector<2x8xf32>
    %12 = arith.maximumf %9, %11 : vector<2x8xf32>
    %13 = math.absf %9 : vector<2x8xf32>
    %cst_15 = arith.constant 0.000000e+00 : f32
    %14 = vector.broadcast %cst_15 : f32 to vector<2x8xf32>
    %15 = arith.subf %14, %13 : vector<2x8xf32>
    %16 = math.exp %15 : vector<2x8xf32>
    %17 = math.log1p %16 : vector<2x8xf32>
    %18 = arith.addf %12, %17 : vector<2x8xf32>
    %c0_16 = arith.constant 0 : index
    %c0_17 = arith.constant 0 : index
    %19 = vector.load %arg5[%c0_16, %c0_17] : memref<2x8xf32, #tpu.memory_space<vmem>>, vector<2x8xf32>
    tpu.vector_store %arg5[%c0_16, %c0_17], %18 {strides = array<i32>} : memref<2x8xf32, #tpu.memory_space<vmem>>, vector<2x8xf32>,
    return
  }
}

</mosaic_0001>

<bundles_post_ra>
// kernel: tpu_custom_call.1
= control target key start
LH: loop header
LB: loop body
LE: loop exit
PB: predicated region body
PF: predicated region fallthrough
CT: control target
= control target key end

     0   :  { %11 = vsyncpa [#allocation3], 0  ;;  %s390_s0 = inlined_call_operand.hbm [shape: f32[2,8,32], index: 0, kind: input, shape index: {}]   ;;  %s391_s1 = inlined_call_operand.hbm [shape: f32[2,8,32], index: 1, kind: input, shape index: {}]   ;;  %s392_s2 = inlined_call_operand.vmem [shape: f32[1,1,32], index: 2, kind: input, shape index: {}]   ;;  %s393_s3 = inlined_call_operand.vmem [shape: f32[1,1,32], index: 3, kind: input, shape index: {}]   ;;  %s394_s4 = inlined_call_operand.hbm [shape: f32[2,8], index: 4, kind: output, shape index: {0}]   ;;  %s395_s5 = inlined_call_operand.hbm [shape: f32[2,8], index: 5, kind: output, shape index: {1}]  }
   0x1   :  { %12 = vsyncpa [#allocation6], 0 }
   0x2   :  { %13 = vsyncpa [#allocation4], 0 }
   0x3   :  { %14 = vsyncpa [#allocation9], 0  ;;  %s286_s18 = smov [#allocation2]   ;;  %s190_s22 = scalar_lea.hbm %s390_s0, 256 }
   0x4   :  { %s20_s19 = sshll.u32 %s286_s18, 4  ;;  %p191_p0 = scmp.ne.s32.totalorder %s390_s0, %s190_s22  ;;  %s21_s19 = int_to_ptr.vmem [resolvable:$true] %s20_s19 }
   0x5   :  { %p194_p1 = scmp.lt.u32.totalorder %s190_s22, %s390_s0 }
   0x7   :  { %p196_p2 = pnand %p194_p1, %p191_p0 }
   0x9   :  { %199 = shalt.err (!%p196_p2)
}
   0xa   :  { %s200_s27 = scalar_lea.vmem %s21_s19, 256  ;;  %p205_p4 = scmp.lt.s32.totalorder %s21_s19, %s21_s19 }
   0xb   :  { %p201_p3 = scmp.ne.s32.totalorder %s21_s19, %s200_s27  ;;  %p206_p5 = scmp.lt.s32.totalorder %s200_s27, %s200_s27 }
   0xd   :  { %p207_p6 = por %p206_p5, %p205_p4 }
   0xf   :  { %p208_p7 = pnand %p207_p6, %p201_p3 }
  0x11   :  { %211 = shalt.err (!%p208_p7)
}
  0x12   :  { %s287_s28 = smov 128   ;;  %s288_s29 = smov 8  }
  0x13   :  { %26 = dma.hbm_to_vmem [thread:$0]  %s390_s0, 256, %s21_s19, [#allocation3], %s287_s28, %s287_s28, %s288_s29  }
  0x14   :  { %s289_s7 = smov [#allocation5]   ;;  %s212_s11 = scalar_lea.hbm %s391_s1, 256 }
  0x15   :  { %s32_s8 = sshll.u32 %s289_s7, 4  ;;  %p213_p8 = scmp.ne.s32.totalorder %s391_s1, %s212_s11  ;;  %s33_s8 = int_to_ptr.vmem [resolvable:$true] %s32_s8 }
  0x16   :  { %p216_p9 = scmp.lt.u32.totalorder %s212_s11, %s391_s1 }
  0x18   :  { %p218_p10 = pnand %p216_p9, %p213_p8 }
  0x1a   :  { %221 = shalt.err (!%p218_p10)
}
  0x1b   :  { %s222_s16 = scalar_lea.vmem %s33_s8, 256  ;;  %p227_p12 = scmp.lt.s32.totalorder %s33_s8, %s33_s8 }
  0x1c   :  { %p223_p11 = scmp.ne.s32.totalorder %s33_s8, %s222_s16  ;;  %p228_p13 = scmp.lt.s32.totalorder %s222_s16, %s222_s16 }
  0x1e   :  { %p229_p0 = por %p228_p13, %p227_p12 }
  0x20   :  { %p230_p1 = pnand %p229_p0, %p223_p11 }
  0x22   :  { %233 = shalt.err (!%p230_p1)
}
  0x23   :  { %38 = dma.hbm_to_vmem [thread:$0]  %s391_s1, 256, %s33_s8, [#allocation6], %s287_s28, %s287_s28, %s288_s29  }
  0x24   :  { %278 = dma.done.wait [#allocation3], 256  }
  0x25   :  { %279 = vsyncadd [#allocation3], 4294967040 }
  0x26   :  { %280 = dma.done.wait [#allocation6], 256  }
  0x27   :  { %281 = vsyncadd [#allocation6], 4294967040  ;;  %vm60_vm0 = vcmask 261120   ;;  %v67_v0 = vld [vmem:[#allocation5] sm:$0xff]  ;;  %v175_v1 = vld [vmem:[%s393_s3] ss:$0 sm:$0xff]  ;;  %v86_v14 = vlaneseq }
  0x28   :  { %v68_v2 = vld [vmem:[#allocation5 + $0x8] sm:$0xff]  ;;  %v76_v3 = vmul.f32 %v175_v1, %v67_v0  ;;  %v49_v5 = vld [vmem:[#allocation2] sm:$0xff]  ;;  %v50_v7 = vld [vmem:[#allocation2 + $0x8] sm:$0xff]  ;;  %s290_s1 = smov [#allocation7]   ;;  %vm96_vm1 = vcmask 1041409   ;;  %vm99_vm2 = vcmask 58368  }
  0x29   :  { %v77_v4 = vmul.f32 %v175_v1, %v68_v2  ;;  %v174_v6 = vld [vmem:[%s392_s2] ss:$0 sm:$0xff]  ;;  %v87_v15 = vand.u32 127, %v86_v14  ;;  %v89_v16 = vshrl.u32 %v86_v14, 7  ;;  %s150_s2 = sshll.u32 %s290_s1, 4  ;;  %s151_s2 = int_to_ptr.vmem [resolvable:$true] %s150_s2 }
  0x2a   :  { %v58_v8 = vmul.f32 %v174_v6, %v49_v5  ;;  %v59_v9 = vmul.f32 %v174_v6, %v50_v7  ;;  %v78_v10 = vsel %vm60_vm0, %v76_v3, 0.0  ;;  %s234_s3 = scalar_lea.vmem %s151_s2, 32  ;;  %p239_p3 = scmp.lt.s32.totalorder %s151_s2, %s151_s2 }
  0x2b   :  { %79 = vadd.xlane.f32.xlu0 %v78_v10  ;;  %v81_v12 = vsel %vm60_vm0, %v77_v4, 0.0  ;;  %v356_v17 = vsub.s32 %v87_v15, %v89_v16  ;;  %p235_p2 = scmp.ne.s32.totalorder %s151_s2, %s234_s3  ;;  %p240_p4 = scmp.lt.s32.totalorder %s234_s3, %s234_s3 }
  0x2c   :  { %v61_v11 = vsel %vm60_vm0, %v58_v8, 0.0  ;;  %v64_v13 = vsel %vm60_vm0, %v59_v9, 0.0 }
  0x2d   :  { %62 = vadd.xlane.f32.xlu1 %v61_v11  ;;  %p241_p5 = por %p240_p4, %p239_p3 }
  0x2f   :  { %82 = vadd.xlane.f32.xlu0 %v81_v12  ;;  %p242_p6 = pnand %p241_p5, %p235_p2 }
  0x31   :  { %65 = vadd.xlane.f32.xlu1 %v64_v13 }
  0xb8   :  { %v80_v18 = vpop.xlane.xlu0 %79 }
  0xb9   :  { %v103_v19 = vand.u32 2147483647, %v80_v18 }
  0xba   :  { %v63_v20 = vpop.xlane.xlu1 %62 }
  0xbb   :  { %v105_v21 = vsub.f32 0.0, %v103_v19  ;;  %v91_v23 = vrot.slane %v63_v20, %v356_v17 }
  0xbc   :  { %v83_v22 = vpop.xlane.xlu0 %82 }
  0xbd   :  { %v107_v24 = vmul.f32 1.442695, %v105_v21  ;;  %v104_v25 = vand.u32 2147483647, %v83_v22 }
  0xbe   :  { %v66_v26 = vpop.xlane.xlu1 %65 }
  0xbf   :  { %v95_v27 = vrot.slane %v66_v26, %v356_v17  ;;  %182 = vpow2.f32 %v107_v24  ;;  %v106_v28 = vsub.f32 0.0, %v104_v25 }
  0xc1   :  { %v97_v29 = vsel %vm96_vm1, %v95_v27, %v91_v23  ;;  %v109_v30 = vmul.f32 1.442695, %v106_v28 }
  0xc2   :  { %100 = vst.msk [vmem:[#allocation7] sm:$0x3] %vm99_vm2, %v97_v29 }
  0xc3   :  { %245 = shalt.err (!%p242_p6)
}
  0xc4   :  { %s246_s24 = scalar_lea.hbm %s394_s4, 32 }
  0xc5   :  { %p247_p7 = scmp.ne.s32.totalorder %s394_s4, %s246_s24  ;;  %p250_p8 = scmp.lt.u32.totalorder %s246_s24, %s394_s4 }
  0xc7   :  { %p252_p9 = pnand %p250_p8, %p247_p7 }
  0xc9   :  { %255 = shalt.err (!%p252_p9)
}
  0xca   :  { %153 = dma.vmem_to_hbm [thread:$0]  %s151_s2, 32, %s394_s4, [#allocation4]   ;;  %184 = vpow2.f32 %v109_v30  ;;  %v183_v31 = vpop.eup %182  ;;  %v101_v46 = vmax.f32 %v80_v18, 0.0  ;;  %v102_v50 = vmax.f32 %v83_v22, 0.0 }
  0xcb   :  { %v111_v32 = vadd.f32 1.0, %v183_v31  ;;  %v114_v35 = vmul.f32 -0.5, %v183_v31  ;;  %v117_v38 = vand.u32 2147483647, %v183_v31  ;;  %s291_s4 = smov [#allocation8]  }
  0xcc   :  { %s160_s6 = sshll.u32 %s291_s4, 4  ;;  %s161_s6 = int_to_ptr.vmem [resolvable:$true] %s160_s6 }
  0xcd   :  { %186 = vlog2.f32 %v111_v32  ;;  %v115_v36 = vadd.f32 1.0, %v114_v35  ;;  %vm118_vm3 = vcmp.lt.f32.partialorder %v117_v38, 0.0004427343  ;;  %s256_s7 = scalar_lea.vmem %s161_s6, 32  ;;  %p261_p11 = scmp.lt.s32.totalorder %s161_s6, %s161_s6 }
  0xce   :  { %p257_p10 = scmp.ne.s32.totalorder %s161_s6, %s256_s7  ;;  %p262_p12 = scmp.lt.s32.totalorder %s256_s7, %s256_s7 }
  0xcf   :  { %v116_v41 = vmul.f32 %v183_v31, %v115_v36 }
  0xd0   :  { %p263_p13 = por %p262_p12, %p261_p11 }
  0xd2   :  { %p264_p0 = pnand %p263_p13, %p257_p10 }
  0xd4   :  { %v185_v33 = vpop.eup %184 }
  0xd5   :  { %v120_v34 = vadd.f32 1.0, %v185_v33  ;;  %v123_v37 = vmul.f32 -0.5, %v185_v33  ;;  %v126_v43 = vand.u32 2147483647, %v185_v33 }
  0xd7   :  { %188 = vlog2.f32 %v120_v34  ;;  %v187_v39 = vpop.eup %186  ;;  %v124_v42 = vadd.f32 1.0, %v123_v37  ;;  %vm127_vm4 = vcmp.lt.f32.partialorder %v126_v43, 0.0004427343 }
  0xd8   :  { %v113_v40 = vmul.f32 0.6931472, %v187_v39 }
  0xd9   :  { %v125_v48 = vmul.f32 %v185_v33, %v124_v42 }
  0xda   :  { %v119_v44 = vsel %vm118_vm3, %v116_v41, %v113_v40 }
  0xdb   :  { %v129_v49 = vadd.f32 %v119_v44, %v101_v46 }
  0xdd   :  { %v136_v53 = vrot.slane %v129_v49, %v356_v17 }
  0xe1   :  { %v189_v45 = vpop.eup %188 }
  0xe2   :  { %v122_v47 = vmul.f32 0.6931472, %v189_v45 }
  0xe4   :  { %v128_v51 = vsel %vm127_vm4, %v125_v48, %v122_v47 }
  0xe5   :  { %v130_v52 = vadd.f32 %v128_v51, %v102_v50 }
  0xe7   :  { %v140_v54 = vrot.slane %v130_v52, %v356_v17 }
  0xe9   :  { %v141_v55 = vsel %vm96_vm1, %v140_v54, %v136_v53 }
  0xea   :  { %143 = vst.msk [vmem:[#allocation8] sm:$0x3] %vm99_vm2, %v141_v55 }
  0xeb   :  { %267 = shalt.err (!%p264_p0)
}
  0xec   :  { %s268_s10 = scalar_lea.hbm %s395_s5, 32 }
  0xed   :  { %p269_p1 = scmp.ne.s32.totalorder %s395_s5, %s268_s10  ;;  %p272_p2 = scmp.lt.u32.totalorder %s268_s10, %s395_s5 }
  0xef   :  { %p274_p3 = pnand %p272_p2, %p269_p1 }
  0xf1   :  { %277 = shalt.err (!%p274_p3)
}
  0xf2   :  { %163 = dma.vmem_to_hbm [thread:$0]  %s161_s6, 32, %s395_s5, [#allocation9]  }
  0xf3   :  { %282 = dma.done.wait [#allocation4], 32  }
  0xf4   :  { %283 = vsyncadd [#allocation4], 4294967264 }
  0xf5   :  { %284 = dma.done.wait [#allocation9], 32  }
  0xf6   :  { %285 = vsyncadd [#allocation9], 4294967264 }
  0xf7   :  { %170 = vsyncpa [#allocation3], 1 }
  0xf8   :  { %171 = vsyncpa [#allocation6], 1 }
  0xf9   :  { %172 = vsyncpa [#allocation4], 1 }
  0xfa   :  { %173 = vsyncpa [#allocation9], 1 }

</bundles_post_ra>
